<compile_context>
chip_gen: v5e
topology: v5e:2x2
jax: 0.10.0
libtpu: 0.0.40
codegen_flags: <defaults>
</compile_context>

<pallas_src>
import functools

import jax
import jax.numpy as jnp
from jax.experimental import pallas as pl
from jax.experimental.pallas import tpu as pltpu


_CDTYPE = jnp.bfloat16   # compute / activation dtype (MXU-native)


def _round_up(x, m):
    return ((x + m - 1) // m) * m


# --------------------------------------------------------------------------
# Pallas kernels
# --------------------------------------------------------------------------
def _conv_mm_kernel(a_ref, b_ref, bias_ref, o_ref, *, relu):
    # bf16 (tm, K) @ (K, tn) on the MXU with f32 accumulation; BN scale is
    # pre-folded into the weights so the epilogue is only bias (+ ReLU).
    acc = jnp.dot(a_ref[...], b_ref[...], preferred_element_type=jnp.float32)
    acc = acc + bias_ref[...]
    if relu:
        acc = jnp.maximum(acc, 0.0)
    o_ref[...] = acc.astype(o_ref.dtype)


def _add_relu_kernel(a_ref, b_ref, o_ref):
    o_ref[...] = jnp.maximum(a_ref[...] + b_ref[...], 0).astype(o_ref.dtype)


def _maxpool_kernel(p_ref, o_ref):
    # p_ref: (9, tm, C) window taps -> max over taps.
    o_ref[...] = jnp.max(p_ref[...], axis=0)


def _avgpool_kernel(x_ref, o_ref):
    # x_ref: (1, H*W, C) -> f32 mean over spatial.
    o_ref[...] = jnp.mean(x_ref[...].astype(jnp.float32), axis=1, keepdims=True)


# --------------------------------------------------------------------------
# Wrappers (glue: im2col / padding / reshapes stay in plain JAX)
# --------------------------------------------------------------------------
_TM_MM = 256    # M tile for conv GEMMs (256x256 MXU on v6e/v7x)
_TM_EW = 512    # row tile for elementwise kernels (HBM-roofline knee)


def conv_bn(x, plan, *, stride, pad, relu):
    """Conv2d(bias=False) + folded eval-mode BatchNorm (+ ReLU).

    x: (N, H, W, Cin_eff) bf16;  plan: prepared weight/bias dict.
    Returns (N, Ho, Wo, Cout_pad) bf16 (padded output lanes carry zeros).
    """
    kh, kw = plan["kh"], plan["kw"]
    k_pad, cout_pad = plan["k_pad"], plan["cout_pad"]
    n, h, wdt, cin = x.shape
    assert cin == plan["cin_eff"], (cin, plan["cin_eff"])

    xp = jnp.pad(x, ((0, 0), (pad, pad), (pad, pad), (0, 0))) if pad else x
    ho = (h + 2 * pad - kh) // stride + 1
    wo = (wdt + 2 * pad - kw) // stride + 1
    m = n * ho * wo
    k = kh * kw * cin

    if kh == 1 and kw == 1 and stride == 1 and pad == 0:
        patches = x.reshape(m, cin)                      # 1x1 conv is a GEMM
    else:
        # im2col (glue), tap-major ordering matches the weight reshape.
        cols = [xp[:, i:i + stride * ho:stride, j:j + stride * wo:stride, :]
                for i in range(kh) for j in range(kw)]
        patches = jnp.stack(cols, axis=3).reshape(m, k)
    if k_pad > k:
        patches = jnp.pad(patches, ((0, 0), (0, k_pad - k)))
    patches = patches.astype(_CDTYPE)

    tm = min(_TM_MM, _round_up(m, 8))
    mpad = _round_up(m, tm)
    if mpad > m:
        patches = jnp.pad(patches, ((0, mpad - m), (0, 0)))
    tn = 256 if cout_pad % 256 == 0 else 128
    gm, gn = mpad // tm, cout_pad // tn

    # Put the larger operand on the outer grid axis so it is streamed once
    # while the smaller one is re-fetched (saves weight HBM re-reads on the
    # small-M / huge-weight late layers).
    if mpad >= cout_pad:
        grid = (gm, gn)
        a_map = lambda i, j: (i, 0)
        b_map = lambda i, j: (0, j)
        v_map = lambda i, j: (0, j)
        o_map = lambda i, j: (i, j)
    else:
        grid = (gn, gm)
        a_map = lambda j, i: (i, 0)
        b_map = lambda j, i: (0, j)
        v_map = lambda j, i: (0, j)
        o_map = lambda j, i: (i, j)

    out = pl.pallas_call(
        functools.partial(_conv_mm_kernel, relu=relu),
        out_shape=jax.ShapeDtypeStruct((mpad, cout_pad), _CDTYPE),
        grid=grid,
        in_specs=[
            pl.BlockSpec((tm, k_pad), a_map),
            pl.BlockSpec((k_pad, tn), b_map),
            pl.BlockSpec((1, tn), v_map),
        ],
        out_specs=pl.BlockSpec((tm, tn), o_map),
        compiler_params=pltpu.CompilerParams(
            dimension_semantics=("parallel", "parallel")),
    )(patches, plan["wmat"], plan["bias"])
    return out[:m].reshape(n, ho, wo, cout_pad)


def add_relu(a, b):
    """Residual add + ReLU on NHWC tensors of identical shape."""
    n, h, w, c = a.shape
    m = n * h * w
    tm = min(_TM_EW, _round_up(m, 8))
    mpad = _round_up(m, tm)
    a2 = jnp.pad(a.reshape(m, c), ((0, mpad - m), (0, 0)))
    b2 = jnp.pad(b.reshape(m, c), ((0, mpad - m), (0, 0)))
    out = pl.pallas_call(
        _add_relu_kernel,
        out_shape=jax.ShapeDtypeStruct((mpad, c), a.dtype),
        grid=(mpad // tm,),
        in_specs=[
            pl.BlockSpec((tm, c), lambda i: (i, 0)),
            pl.BlockSpec((tm, c), lambda i: (i, 0)),
        ],
        out_specs=pl.BlockSpec((tm, c), lambda i: (i, 0)),
        compiler_params=pltpu.CompilerParams(dimension_semantics=("parallel",)),
    )(a2, b2)
    return out[:m].reshape(n, h, w, c)


def maxpool_3x3_s2_p1(x):
    """MaxPool2d(kernel_size=3, stride=2, padding=1) on NHWC."""
    n, h, w, c = x.shape
    kh = kw = 3
    stride, pad = 2, 1
    neg = jnp.finfo(x.dtype).min
    xp = jnp.pad(x, ((0, 0), (pad, pad), (pad, pad), (0, 0)), constant_values=neg)
    ho = (h + 2 * pad - kh) // stride + 1
    wo = (w + 2 * pad - kw) // stride + 1
    cols = [xp[:, i:i + stride * ho:stride, j:j + stride * wo:stride, :]
            for i in range(kh) for j in range(kw)]
    taps = jnp.stack(cols, axis=0).reshape(kh * kw, n * ho * wo, c)

    m = n * ho * wo
    tm = min(_TM_EW, _round_up(m, 8))
    mpad = _round_up(m, tm)
    taps = jnp.pad(taps, ((0, 0), (0, mpad - m), (0, 0)), constant_values=neg)
    out = pl.pallas_call(
        _maxpool_kernel,
        out_shape=jax.ShapeDtypeStruct((mpad, c), x.dtype),
        grid=(mpad // tm,),
        in_specs=[pl.BlockSpec((kh * kw, tm, c), lambda i: (0, i, 0))],
        out_specs=pl.BlockSpec((tm, c), lambda i: (i, 0)),
        compiler_params=pltpu.CompilerParams(dimension_semantics=("parallel",)),
    )(taps)
    return out[:m].reshape(n, ho, wo, c)


def global_avgpool(x):
    """AdaptiveAvgPool2d((1,1)) -> (N, C), f32, tiled over batch."""
    n, h, w, c = x.shape
    x2 = x.reshape(n, h * w, c)
    out = pl.pallas_call(
        _avgpool_kernel,
        out_shape=jax.ShapeDtypeStruct((n, 1, c), jnp.float32),
        grid=(n,),
        in_specs=[pl.BlockSpec((1, h * w, c), lambda i: (i, 0, 0))],
        out_specs=pl.BlockSpec((1, 1, c), lambda i: (i, 0, 0)),
        compiler_params=pltpu.CompilerParams(dimension_semantics=("parallel",)),
    )(x2)
    return out.reshape(n, c)


# --------------------------------------------------------------------------
# Deterministic parameter construction (ResNet50 shapes)
# --------------------------------------------------------------------------
_BN_EPS = 1e-5


def _make_conv_bn_params(key, kh, kw, cin, cout):
    k1, k2, k3, k4, k5 = jax.random.split(key, 5)
    fan_in = kh * kw * cin
    w = jax.random.normal(k1, (kh, kw, cin, cout), jnp.float32) * jnp.sqrt(2.0 / fan_in)
    gamma = 1.0 + 0.1 * jax.random.normal(k2, (cout,), jnp.float32)
    beta = 0.1 * jax.random.normal(k3, (cout,), jnp.float32)
    running_mean = 0.1 * jax.random.normal(k4, (cout,), jnp.float32)
    running_var = 1.0 + 0.1 * jax.random.uniform(k5, (cout,), jnp.float32)
    scale = gamma / jnp.sqrt(running_var + _BN_EPS)
    bias = beta - running_mean * scale
    return {"w": w, "scale": scale, "bias": bias}


def init_resnet50_params(key):
    keys = iter(jax.random.split(key, 256))
    params = {"conv1": _make_conv_bn_params(next(keys), 7, 7, 3, 64)}
    layers = []
    inplanes = 64
    # (num_blocks, planes, first_stride) for layer1..layer4
    for nblocks, planes, first_stride in [(3, 64, 1), (4, 128, 2), (6, 256, 2), (3, 512, 2)]:
        blocks = []
        for b in range(nblocks):
            s = first_stride if b == 0 else 1
            blk = {
                "stride": s,
                "conv1": _make_conv_bn_params(next(keys), 1, 1, inplanes, planes),
                "conv2": _make_conv_bn_params(next(keys), 3, 3, planes, planes),
                "conv3": _make_conv_bn_params(next(keys), 1, 1, planes, planes * 4),
            }
            if s != 1 or inplanes != planes * 4:
                blk["down"] = _make_conv_bn_params(next(keys), 1, 1, inplanes, planes * 4)
            blocks.append(blk)
            inplanes = planes * 4
        layers.append(blocks)
    params["layers"] = layers
    return params


# --------------------------------------------------------------------------
# Offline weight preparation: fold BN scale, pad cin/cout/K, cast to bf16
# --------------------------------------------------------------------------
def _fold_conv_bn(p, cin_eff):
    w = p["w"]
    kh, kw, cin, cout = w.shape
    cout_pad = _round_up(cout, 128)                 # lane-dense output stores
    w = w * p["scale"].reshape(1, 1, 1, cout)       # fold eval-mode BN scale
    if cin_eff > cin:                               # consume padded producer lanes
        w = jnp.pad(w, ((0, 0), (0, 0), (0, cin_eff - cin), (0, 0)))
    if cout_pad > cout:
        w = jnp.pad(w, ((0, 0), (0, 0), (0, 0), (0, cout_pad - cout)))
    k = kh * kw * cin_eff
    k_pad = _round_up(k, 128)                       # aligned MXU contraction
    wmat = w.reshape(k, cout_pad)
    if k_pad > k:
        wmat = jnp.pad(wmat, ((0, k_pad - k), (0, 0)))
    bias = p["bias"]
    if cout_pad > cout:
        bias = jnp.pad(bias, (0, cout_pad - cout))  # padded channels output 0
    return {
        "wmat": wmat.astype(_CDTYPE),
        "bias": bias.reshape(1, cout_pad).astype(jnp.float32),
        "kh": kh, "kw": kw,
        "cin_eff": cin_eff, "k_pad": k_pad, "cout_pad": cout_pad,
    }


def prepare_resnet50(params):
    prep = {"conv1": _fold_conv_bn(params["conv1"], cin_eff=3)}
    ch = prep["conv1"]["cout_pad"]          # channels flowing out of stem / maxpool
    layers = []
    for blocks in params["layers"]:
        pblocks = []
        for blk in blocks:
            p = {"stride": blk["stride"]}
            c1 = _fold_conv_bn(blk["conv1"], cin_eff=ch)
            c2 = _fold_conv_bn(blk["conv2"], cin_eff=c1["cout_pad"])
            c3 = _fold_conv_bn(blk["conv3"], cin_eff=c2["cout_pad"])
            p["conv1"], p["conv2"], p["conv3"] = c1, c2, c3
            if "down" in blk:
                p["down"] = _fold_conv_bn(blk["down"], cin_eff=ch)
            pblocks.append(p)
            ch = c3["cout_pad"]
        layers.append(pblocks)
    prep["layers"] = layers
    return prep


# --------------------------------------------------------------------------
# Forward pass (matches torchvision ResNet50 with fc dropped + squeeze)
# --------------------------------------------------------------------------
def _bottleneck(x, blk):
    s = blk["stride"]
    out = conv_bn(x, blk["conv1"], stride=1, pad=0, relu=True)
    out = conv_bn(out, blk["conv2"], stride=s, pad=1, relu=True)
    out = conv_bn(out, blk["conv3"], stride=1, pad=0, relu=False)
    if "down" in blk:
        identity = conv_bn(x, blk["down"], stride=s, pad=0, relu=False)
    else:
        identity = x
    return add_relu(out, identity)


def resnet50_forward(x_nchw, prep):
    """x_nchw: (N, 3, H, W) float32 -> (N, 2048) (torch.squeeze semantics)."""
    x = jnp.transpose(x_nchw, (0, 2, 3, 1)).astype(_CDTYPE)   # NCHW -> NHWC, bf16
    x = conv_bn(x, prep["conv1"], stride=2, pad=3, relu=True)
    x = maxpool_3x3_s2_p1(x)
    for blocks in prep["layers"]:
        for blk in blocks:
            x = _bottleneck(x, blk)
    feat = global_avgpool(x)               # (N, 2048) f32
    # torch.squeeze: also collapses N==1 -> (2048,), matching the PyTorch spec.
    return jnp.squeeze(feat)


# --------------------------------------------------------------------------
if __name__ == "__main__":
    key = jax.random.PRNGKey(0)
    pkey, xkey = jax.random.split(key)
    params = init_resnet50_params(pkey)
    prep = prepare_resnet50(params)

    # Small input consistent with the module: NCHW, 3 channels.
    x = jax.random.normal(xkey, (2, 3, 32, 32), jnp.float32)

    out = resnet50_forward(x, prep)
    out = jax.block_until_ready(out)
    assert out.shape == (2, 2048), out.shape
    assert jnp.all(jnp.isfinite(out))
    print("KERNEL_OK")
</pallas_src>

<mosaic_0001>
module attributes {stable_mosaic.version = 11 : i64} {
  func.func @_conv_mm_kernel(%arg0: i32, %arg1: i32, %arg2: memref<256x256xbf16, #tpu.memory_space<vmem>>, %arg3: memref<256x128xbf16, #tpu.memory_space<vmem>>, %arg4: memref<1x128xf32, #tpu.memory_space<vmem>>, %arg5: memref<256x128xbf16, #tpu.memory_space<vmem>>) attributes {dimension_semantics = [#tpu.dimension_semantics<parallel>, #tpu.dimension_semantics<parallel>], iteration_bounds = array<i64: 2, 1>, scalar_prefetch = 0 : i64, scratch_operands = 0 : i64, tpu.core_type = #tpu.core_type<tc>, window_params = [{transform_indices = @transform_0, window_bounds = array<i64: 256, 256>}, {transform_indices = @transform_1, window_bounds = array<i64: 256, 128>}, {transform_indices = @transform_2, window_bounds = array<i64: 1, 128>}, {transform_indices = @transform_3, window_bounds = array<i64: 256, 128>}]} {
    %c0 = arith.constant 0 : index
    %c0_0 = arith.constant 0 : index
    %0 = vector.load %arg2[%c0, %c0_0] : memref<256x256xbf16, #tpu.memory_space<vmem>>, vector<256x256xbf16>
    %c0_1 = arith.constant 0 : index
    %c0_2 = arith.constant 0 : index
    %1 = vector.load %arg3[%c0_1, %c0_2] : memref<256x128xbf16, #tpu.memory_space<vmem>>, vector<256x128xbf16>
    %cst = arith.constant dense<0.000000e+00> : vector<256x128xf32>
    %2 = tpu.matmul %0, %1, %cst {dimension_numbers = #tpu.dot_dimension_numbers<[1], [0], [0], [1], [0, 0, 1, 1], [], []>} : vector<256x256xbf16>, vector<256x128xbf16>, vector<256x128xf32> -> vector<256x128xf32>
    %c0_3 = arith.constant 0 : index
    %c0_4 = arith.constant 0 : index
    %3 = vector.load %arg4[%c0_3, %c0_4] : memref<1x128xf32, #tpu.memory_space<vmem>>, vector<1x128xf32>
    %4 = vector.broadcast %3 : vector<1x128xf32> to vector<256x128xf32>
    %5 = arith.addf %2, %4 : vector<256x128xf32>
    %cst_5 = arith.constant 0.000000e+00 : f32
    %6 = vector.broadcast %cst_5 : f32 to vector<256x128xf32>
    %7 = arith.maximumf %5, %6 : vector<256x128xf32>
    %8 = arith.truncf %7 : vector<256x128xf32> to vector<256x128xbf16>
    %c0_6 = arith.constant 0 : index
    %c0_7 = arith.constant 0 : index
    %9 = vector.load %arg5[%c0_6, %c0_7] : memref<256x128xbf16, #tpu.memory_space<vmem>>, vector<256x128xbf16>
    tpu.vector_store %arg5[%c0_6, %c0_7], %8 {strides = array<i32>} : memref<256x128xbf16, #tpu.memory_space<vmem>>, vector<256x128xbf16>,
    return
  }
  func.func @transform_0(%arg0: i32, %arg1: i32) -> (i32, i32) {
    %c0_i32 = arith.constant 0 : i32
    %c0_i32_0 = arith.constant 0 : i32
    return %arg0, %c0_i32 : i32, i32
  }
  func.func @transform_1(%arg0: i32, %arg1: i32) -> (i32, i32) {
    %c0_i32 = arith.constant 0 : i32
    %c0_i32_0 = arith.constant 0 : i32
    return %c0_i32, %arg1 : i32, i32
  }
  func.func @transform_2(%arg0: i32, %arg1: i32) -> (i32, i32) {
    %c0_i32 = arith.constant 0 : i32
    %c0_i32_0 = arith.constant 0 : i32
    return %c0_i32, %arg1 : i32, i32
  }
  func.func @transform_3(%arg0: i32, %arg1: i32) -> (i32, i32) {
    %c0_i32 = arith.constant 0 : i32
    return %arg0, %arg1 : i32, i32
  }
}

</mosaic_0001>

<bundles_post_ra>
// kernel: tpu_custom_call.1
= control target key start
LH: loop header
LB: loop body
LE: loop exit
PB: predicated region body
PF: predicated region fallthrough
CT: control target
= control target key end

     0   :  { %s1868_s0 = inlined_call_operand.hbm [shape: bf16[512,256], index: 0, kind: input, shape index: {}]   ;;  %s1869_s1 = inlined_call_operand.hbm [shape: bf16[256,128], index: 1, kind: input, shape index: {}]   ;;  %s1870_s2 = inlined_call_operand.vmem [shape: f32[1,128], index: 2, kind: input, shape index: {}]   ;;  %s1871_s3 = inlined_call_operand.hbm [shape: bf16[512,128], index: 3, kind: output, shape index: {}]  }
   0x1   :  { %1872 = sst [smem:[#allocation11_spill]] %s1869_s1 }
   0x2   :  { %8 = vsyncpa [#allocation3], 0 }
   0x3   :  { %10 = vsyncpa [#allocation3 + $0x1], 0 }
   0x4   :  { %11 = vsyncpa [#allocation6], 0 }
   0x5   :  { %12 = vsyncpa [#allocation4], 0 }
   0x6   :  { %14 = vsyncpa [#allocation4 + $0x1], 0  ;;  %s1596_s12 = smov 0   ;;  %s1598_s13 = smov 0  }
   0x7   :  { %s1600_s14 = smov 0   ;;  %s1602_s15 = smov 0  }
   0x8   :  { %s1604_s16 = smov 0   ;;  %s1606_s17 = smov 0  }
   0x9 LB: > { %s968_s18 = sadd.s32 4294967295, %s1567_s17   ;;  %s969_s19 = sadd.s32 4294967294, %s1567_s17   ;;  %s1567_s17 = sphi %s1606_s17, %s20_s17   ;;  %s1563_s16 = sphi %s1604_s16, %s1885_s16   ;;  %s1559_s15 = sphi %s1602_s15, %s1884_s15   ;;  %s1555_s14 = sphi %s1600_s14, %s1883_s14   ;;  %s1551_s13 = sphi %s1598_s13, %s1882_s13   ;;  %s1547_s12 = sphi %s1596_s12, %s1881_s12  }
   0xa   : > { %p52_p0 = scmp.ne.s32.totalorder %s1551_s13, %s1547_s12  ;;  %p1630_p1 = scmp.eq.s32.totalorder %s968_s18, 0 }
   0xb   : > { %p1634_p2 = scmp.eq.s32.totalorder %s968_s18, 1  ;;  %p136_p3 = scmp.eq.s32.totalorder %s969_s19, 1 }
   0xc   : > { %p1640_p4 = por %p1630_p1, %p52_p0  ;;  %p970_p5 = scmp.ge.s32.totalorder %s1567_s17, 1 }
   0xd   : > { %p1645_p6 = por %p136_p3, %p52_p0  ;;  %p143_p7 = scmp.lt.s32.totalorder %s1567_s17, 3 }
   0xe   : > { %s1877_s1 = sld [smem:[#allocation11_spill]]  ;;  %s1569_s28 = smov [#allocation5]  }
   0xf   : > { %p1653_p8 = pnand %p970_p5, %p143_p7  ;;  %s158_s29 = sshll.u32 %s1569_s28, 4  ;;  %s159_s29 = int_to_ptr.vmem [resolvable:$true] %s158_s29 }
  0x10   : > { %p973_p11 = scmp.ge.s32.totalorder %s1567_s17, 2  ;;  %s1570_s30 = smov 64  }
  0x11   : > { %p1349_p9 = pneg %p1653_p8  ;;  %s1571_s4 = smov 4  }
  0x12   : > { %s32_s5 = sadd.s32 1, %s1563_s16  ;;  %s39_s6 = sadd.s32 1, %s1555_s14 }
  0x13   : > { %p1350_p10 = pnand %p1349_p9, %p1630_p1  ;;  %p34_p12 = scmp.ge.s32.totalorder %s32_s5, 2 }
  0x14   : > { %s156_s26 = sshll.u32 %s1877_s1, 4  ;;  %p46_p13 = scmp.ne.s32.totalorder %s1555_s14, %s1551_s13  ;;  %s157_s26 = int_to_ptr.hbm [resolvable:$true] %s156_s26 }
  0x15   : > { %1352 = dma.hbm_to_vmem [thread:$0]  (!%p1350_p10), %s157_s26, 2048, %s159_s29, [#allocation6], %s1570_s30, %s1570_s30, %s1571_s4  }
  0x16   : > { %p47_p0 = scmp.eq.s32.totalorder %s1567_s17, 0  ;;  %s1887_s5 = smov (%p34_p12, %s32_s5), 0 }
  0x17   : > { %p1675_p5 = por %p1634_p2, %p46_p13  ;;  %s36_s9 = ssub.s32 %s1563_s16, %s1887_s5 }
  0x18   : > { %p1669_p3 = por %p47_p0, %p46_p13  ;;  %p1362_p7 = scmp.lt.s32.totalorder %s1567_s17, 2 }
  0x19   : > { %p37_p9 = scmp.eq.s32.totalorder %s36_s9, 0  ;;  %s178_s10 = sand.u32 1, %s1555_s14  }
  0x1a   : > { %s974_s11 = sshll.u32 %s178_s10, 8  ;;  %s1180_s19 = sshll.u32 %s1563_s16, 8 }
  0x1b   : > { %s1684_s18 = scalar_select %p37_p9, %s1555_s14, %s39_s6  }
  0x1c   : > { %s188_s26 = scalar_lea.hbm %s1868_s0, %s1180_s19  ;;  %s182_s28 = scalar_lea.vmem [#allocation2], %s974_s11 }
  0x1d   : > { %s191_s29 = sshll.u32 %s182_s28, 4  ;;  %s189_s21 = sshll.u32 %s188_s26, 4  ;;  %s192_s29 = int_to_ptr.vmem [resolvable:$true] %s191_s29  ;;  %s190_s21 = int_to_ptr.hbm [resolvable:$true] %s189_s21 }
  0x1e   : > { %p1354_p2 = pnand %p1362_p7, %p1669_p3  ;;  %s179_s30 = scalar_lea.sflag [#allocation3], %s178_s10 }
  0x1f   : > { %s1572_s4 = smov 128   ;;  %s1573_s1 = smov 8  }
  0x20   : > { %1356 = dma.hbm_to_vmem [thread:$0]  (!%p1354_p2), %s190_s21, 4096, %s192_s29, %s179_s30, %s1572_s4, %s1572_s4, %s1573_s1  }
  0x21   : > { %203 = sbr.rel (%p1653_p8) target bundleno = 337 (0x151), region = 32  ;;  %s1695_s6 = sand.u32 (!%p1653_p8), 1, %s1551_s13  }
  0x22   : > { %s979_s9 = sshll.u32 (!%p1653_p8), %s1695_s6, 8  ;;  %s206_s11 = scalar_lea.sflag (!%p1653_p8), [#allocation3], %s1695_s6 }
  0x23   : > { %s1699_s19 = scalar_lea.vmem (!%p1653_p8), [#allocation2], %s979_s9 }
  0x26   : > { %1534 = dma.done.wait (%p1640_p4), %s206_s11, 4096  }
  0x27   : > { %1536 = vsyncadd (%p1640_p4), %s206_s11, 4294963200 }
  0x28   : > { %1538 = dma.done.wait (%p1630_p1), [#allocation6], 2048  }
  0x29   : > { %1540 = vsyncadd (%p1630_p1), [#allocation6], 4294965248  ;;  %v1220_v0 = vld [vmem:[#allocation5 + $0x38] sm:$0xff]  ;;  %v1219_v2 = vld [vmem:[#allocation5 + $0x30] sm:$0xff]  ;;  %s981_s22 = sshll.u32 %s1695_s6, 7  ;;  %s1229_s7 = sshll.u32 %s1559_s15, 7 }
  0x2a   : > { %v1228_v1 = vld [vmem:[#allocation5 + $0x78] sm:$0xff]  ;;  %570 = vmatpush.bf16.msra.mxu0 %v1220_v0  ;;  %1325 = vmatpush.bf16.msra.mxu2 %v1220_v0  ;;  %v1227_v3 = vld [vmem:[#allocation5 + $0x70] sm:$0xff]  ;;  %v1218_v4 = vld [vmem:[#allocation5 + $0x28] sm:$0xff]  ;;  %s1783_s27 = scalar_lea.vmem [#allocation7], %s981_s22  ;;  %s857_s25 = scalar_lea.hbm %s1871_s3, %s1229_s7 }
  0x2b   : > { %659 = vmatpush.bf16.msra.mxu1 %v1228_v1  ;;  %1333 = vmatpush.bf16.msra.mxu3 %v1228_v1  ;;  %v1226_v5 = vld [vmem:[#allocation5 + $0x68] sm:$0xff]  ;;  %v1217_v6 = vld [vmem:[#allocation5 + $0x20] sm:$0xff]  ;;  %v1216_v8 = vld [vmem:[#allocation5 + $0x18] sm:$0xff]  ;;  %s858_s26 = sshll.u32 %s1783_s27, 4  ;;  %s860_s28 = sshll.u32 %s857_s25, 4  ;;  %s859_s26 = int_to_ptr.vmem [resolvable:$true] %s858_s26  ;;  %s861_s28 = int_to_ptr.hbm [resolvable:$true] %s860_s28 }
  0x2c   : > { %v1225_v7 = vld [vmem:[#allocation5 + $0x60] sm:$0xff]  ;;  %v1224_v9 = vld [vmem:[#allocation5 + $0x58] sm:$0xff]  ;;  %v1215_v10 = vld [vmem:[#allocation5 + $0x10] sm:$0xff]  ;;  %s845_s15 = scalar_lea.sflag [#allocation4], %s1695_s6  ;;  %s1495_s29 = sshra.s32 %s861_s28, 4  ;;  %s1496_s29 = int_to_ptr.hbm [resolvable:$true] %s1495_s29 }
  0x2d   : > { %v1223_v11 = vld [vmem:[#allocation5 + $0x50] sm:$0xff]  ;;  %v1214_v12 = vld [vmem:[#allocation5 + $0x8] sm:$0xff]  ;;  %v1213_v14 = vld [vmem:[#allocation5] sm:$0xff]  ;;  %s1497_s21 = scalar_lea.hbm %s1496_s29, 128  ;;  %s1501_s9 = scalar_lea.hbm %s1871_s3, 256 }
  0x2e   : > { %571 = vmatpush.bf16.msra.mxu0 %v1219_v2  ;;  %1326 = vmatpush.bf16.msra.mxu2 %v1219_v2  ;;  %v1222_v13 = vld [vmem:[#allocation5 + $0x48] sm:$0xff]  ;;  %v1221_v15 = vld [vmem:[#allocation5 + $0x40] sm:$0xff]  ;;  %v992_v28 = vld [vmem:[%s1699_s19 + $0x10] sm:$0xf]  ;;  %p1498_p1 = scmp.ne.s32.totalorder %s1496_s29, %s1497_s21  ;;  %p1502_p10 = scmp.lt.s32.totalorder %s1496_s29, %s1871_s3 }
  0x2f   : > { %660 = vmatpush.bf16.msra.mxu1 %v1227_v3  ;;  %1334 = vmatpush.bf16.msra.mxu3 %v1227_v3  ;;  %v984_v16 = vld [vmem:[%s1699_s19] sm:$0xf]  ;;  %v1182_v17 = vld [vmem:[%s1699_s19 + $0x4] sm:$0xf0]  ;;  %v1181_v20 = vld [vmem:[%s1699_s19 + $0x4] sm:$0xf]  ;;  %p1503_p12 = scmp.lt.s32.totalorder %s1501_s9, %s1497_s21 }
  0x30   : > { %v1048_v18 = vld [vmem:[%s1699_s19 + $0x80] sm:$0xf]  ;;  %v1198_v19 = vld [vmem:[%s1699_s19 + $0x84] sm:$0xf0]  ;;  %v986_v21 = vld [vmem:[%s1699_s19 + $0x8] sm:$0xf0]  ;;  %v985_v24 = vor.u32 %v1182_v17, %v984_v16  ;;  %p1499_p4 = pnand %p1498_p1, %p1675_p5 }
  0x31   : > { %v1197_v22 = vld [vmem:[%s1699_s19 + $0x84] sm:$0xf]  ;;  %v1050_v23 = vld [vmem:[%s1699_s19 + $0x88] sm:$0xf0]  ;;  %v1049_v25 = vor.u32 %v1198_v19, %v1048_v18  ;;  %v989_v26 = vor.u32 %v1181_v20, %v986_v21  ;;  %v1184_v29 = vld [vmem:[%s1699_s19 + $0x14] sm:$0xf0]  ;;  %p1504_p13 = por %p1503_p12, %p1502_p10 }
  0x32   : > { %572 = vmatpush.bf16.msra.mxu0 %v1218_v4  ;;  %1327 = vmatpush.bf16.msra.mxu2 %v1218_v4  ;;  %v1053_v27 = vor.u32 %v1197_v22, %v1050_v23  ;;  %v1056_v30 = vld [vmem:[%s1699_s19 + $0x90] sm:$0xf]  ;;  %v1200_v31 = vld [vmem:[%s1699_s19 + $0x94] sm:$0xf0]  ;;  %v1183_v32 = vld [vmem:[%s1699_s19 + $0x14] sm:$0xf]  ;;  %v993_v36 = vor.u32 %v1184_v29, %v992_v28  ;;  %p1500_p8 = pneg %p1499_p4 }
  0x33   : > { %661 = vmatpush.bf16.msra.mxu1 %v1226_v5  ;;  %1335 = vmatpush.bf16.msra.mxu3 %v1226_v5  ;;  %v994_v33 = vld [vmem:[%s1699_s19 + $0x18] sm:$0xf0]  ;;  %v1199_v34 = vld [vmem:[%s1699_s19 + $0x94] sm:$0xf]  ;;  %v1057_v37 = vor.u32 %v1200_v31, %v1056_v30  ;;  %v1000_v40 = vld [vmem:[%s1699_s19 + $0x20] sm:$0xf] }
  0x34   : > { %v1058_v35 = vld [vmem:[%s1699_s19 + $0x98] sm:$0xf0]  ;;  %v997_v38 = vor.u32 %v1183_v32, %v994_v33  ;;  %v1186_v41 = vld [vmem:[%s1699_s19 + $0x24] sm:$0xf0]  ;;  %v1064_v42 = vld [vmem:[%s1699_s19 + $0xa0] sm:$0xf]  ;;  %p1505_p0 = pnand %p1504_p13, %p1500_p8 }
  0x35   : > { %v1061_v39 = vor.u32 %v1199_v34, %v1058_v35  ;;  %v1202_v43 = vld [vmem:[%s1699_s19 + $0xa4] sm:$0xf0]  ;;  %v1185_v44 = vld [vmem:[%s1699_s19 + $0x24] sm:$0xf]  ;;  %v1002_v45 = vld [vmem:[%s1699_s19 + $0x28] sm:$0xf0]  ;;  %v1001_v48 = vor.u32 %v1186_v41, %v1000_v40 }
  0x36   : > { %573 = vmatpush.bf16.msra.mxu0 %v1217_v6  ;;  %1328 = vmatpush.bf16.msra.mxu2 %v1217_v6  ;;  %v1201_v46 = vld [vmem:[%s1699_s19 + $0xa4] sm:$0xf]  ;;  %v1066_v47 = vld [vmem:[%s1699_s19 + $0xa8] sm:$0xf0]  ;;  %v1065_v49 = vor.u32 %v1202_v43, %v1064_v42  ;;  %v1005_v50 = vor.u32 %v1185_v44, %v1002_v45  ;;  %v1008_v52 = vld [vmem:[%s1699_s19 + $0x30] sm:$0xf] }
  0x37   : > { %662 = vmatpush.bf16.msra.mxu1 %v1225_v7  ;;  %1336 = vmatpush.bf16.msra.mxu3 %v1225_v7  ;;  %v1069_v51 = vor.u32 %v1201_v46, %v1066_v47  ;;  %v1188_v53 = vld [vmem:[%s1699_s19 + $0x34] sm:$0xf0]  ;;  %v1072_v54 = vld [vmem:[%s1699_s19 + $0xb0] sm:$0xf]  ;;  %v1187_v56 = vld [vmem:[%s1699_s19 + $0x34] sm:$0xf] }
  0x38   : > { %v1204_v55 = vld [vmem:[%s1699_s19 + $0xb4] sm:$0xf0]  ;;  %v1010_v57 = vld [vmem:[%s1699_s19 + $0x38] sm:$0xf0]  ;;  %v1203_v58 = vld [vmem:[%s1699_s19 + $0xb4] sm:$0xf]  ;;  %v1009_v60 = vor.u32 %v1188_v53, %v1008_v52 }
  0x39   : > { %v1074_v59 = vld [vmem:[%s1699_s19 + $0xb8] sm:$0xf0]  ;;  %v1073_v61 = vor.u32 %v1204_v55, %v1072_v54  ;;  %v1013_v62 = vor.u32 %v1187_v56, %v1010_v57  ;;  %v1016_v0 = vld [vmem:[%s1699_s19 + $0x40] sm:$0xf]  ;;  %v1190_v1 = vld [vmem:[%s1699_s19 + $0x44] sm:$0xf0] }
  0x3a   : > { %574 = vmatpush.bf16.msra.mxu0 %v1216_v8  ;;  %1329 = vmatpush.bf16.msra.mxu2 %v1216_v8  ;;  %v1077_v63 = vor.u32 %v1203_v58, %v1074_v59  ;;  %v1080_v2 = vld [vmem:[%s1699_s19 + $0xc0] sm:$0xf]  ;;  %v1206_v3 = vld [vmem:[%s1699_s19 + $0xc4] sm:$0xf0]  ;;  %v1189_v4 = vld [vmem:[%s1699_s19 + $0x44] sm:$0xf]  ;;  %v1017_v8 = vor.u32 %v1190_v1, %v1016_v0 }
  0x3b   : > { %663 = vmatpush.bf16.msra.mxu1 %v1224_v9  ;;  %1337 = vmatpush.bf16.msra.mxu3 %v1224_v9  ;;  %v1018_v5 = vld [vmem:[%s1699_s19 + $0x48] sm:$0xf0]  ;;  %v1205_v6 = vld [vmem:[%s1699_s19 + $0xc4] sm:$0xf]  ;;  %v1081_v9 = vor.u32 %v1206_v3, %v1080_v2  ;;  %v1191_v16 = vld [vmem:[%s1699_s19 + $0x54] sm:$0xf] }
  0x3c   : > { %v1082_v7 = vld [vmem:[%s1699_s19 + $0xc8] sm:$0xf0]  ;;  %v1026_v17 = vld [vmem:[%s1699_s19 + $0x58] sm:$0xf0]  ;;  %v1207_v18 = vld [vmem:[%s1699_s19 + $0xd4] sm:$0xf] }
  0x3d   : > { %v1090_v19 = vld [vmem:[%s1699_s19 + $0xd8] sm:$0xf0]  ;;  %v1029_v22 = vor.u32 %v1191_v16, %v1026_v17  ;;  %v1193_v28 = vld [vmem:[%s1699_s19 + $0x64] sm:$0xf]  ;;  %v1034_v29 = vld [vmem:[%s1699_s19 + $0x68] sm:$0xf0] }
  0x3e   : > { %575 = vmatpush.bf16.msra.mxu0 %v1215_v10  ;;  %1330 = vmatpush.bf16.msra.mxu2 %v1215_v10  ;;  %v1021_v10 = vor.u32 %v1189_v4, %v1018_v5  ;;  %v1093_v23 = vor.u32 %v1207_v18, %v1090_v19  ;;  %v1209_v30 = vld [vmem:[%s1699_s19 + $0xe4] sm:$0xf]  ;;  %v1098_v31 = vld [vmem:[%s1699_s19 + $0xe8] sm:$0xf0]  ;;  %v1037_v34 = vor.u32 %v1193_v28, %v1034_v29  ;;  %v1195_v40 = vld [vmem:[%s1699_s19 + $0x74] sm:$0xf] }
  0x3f   : > { %664 = vmatpush.bf16.msra.mxu1 %v1223_v11  ;;  %1338 = vmatpush.bf16.msra.mxu3 %v1223_v11  ;;  %v1085_v11 = vor.u32 %v1205_v6, %v1082_v7  ;;  %v1101_v35 = vor.u32 %v1209_v30, %v1098_v31  ;;  %v1042_v41 = vld [vmem:[%s1699_s19 + $0x78] sm:$0xf0]  ;;  %v1211_v42 = vld [vmem:[%s1699_s19 + $0xf4] sm:$0xf] }
  0x40   : > { %v1106_v43 = vld [vmem:[%s1699_s19 + $0xf8] sm:$0xf0]  ;;  %v1045_v46 = vor.u32 %v1195_v40, %v1042_v41 }
  0x41   : > { %v1109_v47 = vor.u32 %v1211_v42, %v1106_v43 }
  0x42   : > { %576 = vmatpush.bf16.msra.mxu0 %v1214_v12  ;;  %1331 = vmatpush.bf16.msra.mxu2 %v1214_v12  ;;  %v1024_v12 = vld [vmem:[%s1699_s19 + $0x50] sm:$0xf] }
  0x43   : > { %665 = vmatpush.bf16.msra.mxu1 %v1222_v13  ;;  %1339 = vmatpush.bf16.msra.mxu3 %v1222_v13  ;;  %v1192_v13 = vld [vmem:[%s1699_s19 + $0x54] sm:$0xf0] }
  0x44   : > { %v1025_v20 = vor.u32 %v1192_v13, %v1024_v12 }
  0x46   : > { %577 = vmatpush.bf16.msra.mxu0 %v1213_v14  ;;  %1332 = vmatpush.bf16.msra.mxu2 %v1213_v14  ;;  %v1088_v14 = vld [vmem:[%s1699_s19 + $0xd0] sm:$0xf] }
  0x47   : > { %666 = vmatpush.bf16.msra.mxu1 %v1221_v15  ;;  %1340 = vmatpush.bf16.msra.mxu3 %v1221_v15  ;;  %v1208_v15 = vld [vmem:[%s1699_s19 + $0xd4] sm:$0xf0] }
  0x48   : > { %v1089_v21 = vor.u32 %v1208_v15, %v1088_v14 }
  0x49   : > { %578 = vmatmul.bf16.vlgmr.msra.gmra.mxu0 %v985_v24  ;;  %618 = vmatmul.bf16.vlgmr.msra.gmra.mxu2 %v1049_v25  ;;  %v1032_v24 = vld [vmem:[%s1699_s19 + $0x60] sm:$0xf]  ;;  %v1194_v25 = vld [vmem:[%s1699_s19 + $0x64] sm:$0xf0] }
  0x4a   : > { %667 = vmatmul.bf16.vlgmr.msra.gmra.mxu1 %v989_v26  ;;  %707 = vmatmul.bf16.vlgmr.msra.gmra.mxu3 %v1053_v27  ;;  %v1096_v26 = vld [vmem:[%s1699_s19 + $0xe0] sm:$0xf]  ;;  %v1210_v27 = vld [vmem:[%s1699_s19 + $0xe4] sm:$0xf0]  ;;  %v1033_v32 = vor.u32 %v1194_v25, %v1032_v24 }
  0x4b   : > { %v1097_v33 = vor.u32 %v1210_v27, %v1096_v26 }
  0x59   : > { %583 = vmatmul.bf16.gmra.mxu0 %v993_v36  ;;  %623 = vmatmul.bf16.gmra.mxu2 %v1057_v37  ;;  %v1040_v36 = vld [vmem:[%s1699_s19 + $0x70] sm:$0xf]  ;;  %v1196_v37 = vld [vmem:[%s1699_s19 + $0x74] sm:$0xf0] }
  0x5a   : > { %672 = vmatmul.bf16.gmra.mxu1 %v997_v38  ;;  %712 = vmatmul.bf16.gmra.mxu3 %v1061_v39  ;;  %v1104_v38 = vld [vmem:[%s1699_s19 + $0xf0] sm:$0xf]  ;;  %v1212_v39 = vld [vmem:[%s1699_s19 + $0xf4] sm:$0xf0]  ;;  %v1041_v44 = vor.u32 %v1196_v37, %v1040_v36 }
  0x5b   : > { %v1105_v45 = vor.u32 %v1212_v39, %v1104_v38 }
  0x69   : > { %588 = vmatmul.bf16.gmra.mxu0 %v1001_v48  ;;  %628 = vmatmul.bf16.gmra.mxu2 %v1065_v49  ;;  %v1776_v49 = vld [vmem:[%s1870_s2] ss:$0 sm:$0xff] }
  0x6a   : > { %677 = vmatmul.bf16.gmra.mxu1 %v1005_v50  ;;  %717 = vmatmul.bf16.gmra.mxu3 %v1069_v51 }
  0x79   : > { %593 = vmatmul.bf16.gmra.mxu0 %v1009_v60  ;;  %633 = vmatmul.bf16.gmra.mxu2 %v1073_v61 }
  0x7a   : > { %682 = vmatmul.bf16.gmra.mxu1 %v1013_v62  ;;  %722 = vmatmul.bf16.gmra.mxu3 %v1077_v63 }
  0x89   : > { %598 = vmatmul.bf16.gmra.mxu0 %v1017_v8  ;;  %638 = vmatmul.bf16.gmra.mxu2 %v1081_v9 }
  0x8a   : > { %687 = vmatmul.bf16.gmra.mxu1 %v1021_v10  ;;  %727 = vmatmul.bf16.gmra.mxu3 %v1085_v11 }
  0x99   : > { %603 = vmatmul.bf16.gmra.mxu0 %v1025_v20  ;;  %643 = vmatmul.bf16.gmra.mxu2 %v1089_v21 }
  0x9a   : > { %692 = vmatmul.bf16.gmra.mxu1 %v1029_v22  ;;  %732 = vmatmul.bf16.gmra.mxu3 %v1093_v23 }
  0xa9   : > { %608 = vmatmul.bf16.gmra.mxu0 %v1033_v32  ;;  %648 = vmatmul.bf16.gmra.mxu2 %v1097_v33 }
  0xaa   : > { %697 = vmatmul.bf16.gmra.mxu1 %v1037_v34  ;;  %737 = vmatmul.bf16.gmra.mxu3 %v1101_v35 }
  0xb9   : > { %613 = vmatmul.bf16.gmra.mxu0 %v1041_v44  ;;  %653 = vmatmul.bf16.gmra.mxu2 %v1105_v45 }
  0xba   : > { %702 = vmatmul.bf16.gmra.mxu1 %v1045_v46  ;;  %742 = vmatmul.bf16.gmra.mxu3 %v1109_v47 }
  0xc6   : > { %v579_v48 = vpop.f32.mrf.mxu0 }
  0xc7   : > { %v668_v50 = vpop.f32.mrf.mxu1  ;;  %v580_v51 = vadd.f32 %v1776_v49, %v579_v48 }
  0xc9   : > { %v669_v55 = vadd.f32 %v668_v50, %v580_v51 }
  0xcb   : > { %v748_v60 = vmax.f32 %v669_v55, 0.0 }
  0xcc   : > { %v619_v52 = vpop.f32.mrf.mxu2 }
  0xcd   : > { %v708_v53 = vpop.f32.mrf.mxu3  ;;  %v620_v58 = vadd.f32 %v1776_v49, %v619_v52 }
  0xce   : > { %v581_v54 = vpop.f32.mrf.mxu0 }
  0xcf   : > { %v582_v56 = vadd.f32 %v1776_v49, %v581_v54  ;;  %v670_v57 = vpop.f32.mrf.mxu1  ;;  %v709_v63 = vadd.f32 %v708_v53, %v620_v58 }
  0xd1   : > { %v671_v59 = vadd.f32 %v670_v57, %v582_v56  ;;  %v764_v6 = vmax.f32 %v709_v63, 0.0 }
  0xd3   : > { %v749_v61 = vmax.f32 %v671_v59, 0.0 }
  0xd4   : > { %v621_v62 = vpop.f32.mrf.mxu2 }
  0xd5   : > { %v1233_v0 = vpack.c.bf16 %v749_v61, %v748_v60  ;;  %v622_v1 = vadd.f32 %v1776_v49, %v621_v62  ;;  %v710_v2 = vpop.f32.mrf.mxu3 }
  0xd6   : > { %v584_v3 = vpop.f32.mrf.mxu0 }
  0xd7   : > { %1234 = vst [vmem:[%s1783_s27] sm:$0xff] %v1233_v0   ;;  %v711_v4 = vadd.f32 %v710_v2, %v622_v1  ;;  %v673_v5 = vpop.f32.mrf.mxu1  ;;  %v585_v9 = vadd.f32 %v1776_v49, %v584_v3 }
  0xd9   : > { %v765_v7 = vmax.f32 %v711_v4, 0.0  ;;  %v674_v13 = vadd.f32 %v673_v5, %v585_v9 }
  0xdb   : > { %v1273_v8 = vpack.c.bf16 %v765_v7, %v764_v6  ;;  %v750_v18 = vmax.f32 %v674_v13, 0.0 }
  0xdc   : > { %v624_v10 = vpop.f32.mrf.mxu2 }
  0xdd   : > { %1317 = vst [vmem:[%s1783_s27 + $0x40] sm:$0xff] %v1273_v8   ;;  %v713_v11 = vpop.f32.mrf.mxu3  ;;  %v625_v16 = vadd.f32 %v1776_v49, %v624_v10 }
  0xde   : > { %v586_v12 = vpop.f32.mrf.mxu0 }
  0xdf   : > { %v587_v14 = vadd.f32 %v1776_v49, %v586_v12  ;;  %v675_v15 = vpop.f32.mrf.mxu1  ;;  %v714_v21 = vadd.f32 %v713_v11, %v625_v16 }
  0xe1   : > { %v676_v17 = vadd.f32 %v675_v15, %v587_v14  ;;  %v766_v28 = vmax.f32 %v714_v21, 0.0 }
  0xe3   : > { %v751_v19 = vmax.f32 %v676_v17, 0.0 }
  0xe4   : > { %v626_v20 = vpop.f32.mrf.mxu2 }
  0xe5   : > { %v1238_v22 = vpack.c.bf16 %v751_v19, %v750_v18  ;;  %v627_v23 = vadd.f32 %v1776_v49, %v626_v20  ;;  %v715_v24 = vpop.f32.mrf.mxu3 }
  0xe6   : > { %v589_v25 = vpop.f32.mrf.mxu0 }
  0xe7   : > { %1310 = vst [vmem:[%s1783_s27 + $0x8] sm:$0xff] %v1238_v22   ;;  %v716_v26 = vadd.f32 %v715_v24, %v627_v23  ;;  %v678_v27 = vpop.f32.mrf.mxu1  ;;  %v590_v31 = vadd.f32 %v1776_v49, %v589_v25 }
  0xe9   : > { %v767_v29 = vmax.f32 %v716_v26, 0.0  ;;  %v679_v35 = vadd.f32 %v678_v27, %v590_v31 }
  0xeb   : > { %v1278_v30 = vpack.c.bf16 %v767_v29, %v766_v28  ;;  %v752_v40 = vmax.f32 %v679_v35, 0.0 }
  0xec   : > { %v629_v32 = vpop.f32.mrf.mxu2 }
  0xed   : > { %1318 = vst [vmem:[%s1783_s27 + $0x48] sm:$0xff] %v1278_v30   ;;  %v718_v33 = vpop.f32.mrf.mxu3  ;;  %v630_v38 = vadd.f32 %v1776_v49, %v629_v32 }
  0xee   : > { %v591_v34 = vpop.f32.mrf.mxu0 }
  0xef   : > { %v592_v36 = vadd.f32 %v1776_v49, %v591_v34  ;;  %v680_v37 = vpop.f32.mrf.mxu1  ;;  %v719_v43 = vadd.f32 %v718_v33, %v630_v38 }
  0xf1   : > { %v681_v39 = vadd.f32 %v680_v37, %v592_v36  ;;  %v768_v51 = vmax.f32 %v719_v43, 0.0 }
  0xf3   : > { %v753_v41 = vmax.f32 %v681_v39, 0.0 }
  0xf4   : > { %v631_v42 = vpop.f32.mrf.mxu2 }
  0xf5   : > { %v1243_v44 = vpack.c.bf16 %v753_v41, %v752_v40  ;;  %v632_v45 = vadd.f32 %v1776_v49, %v631_v42  ;;  %v720_v46 = vpop.f32.mrf.mxu3 }
  0xf6   : > { %v594_v47 = vpop.f32.mrf.mxu0 }
  0xf7   : > { %1311 = vst [vmem:[%s1783_s27 + $0x10] sm:$0xff] %v1243_v44   ;;  %v721_v48 = vadd.f32 %v720_v46, %v632_v45  ;;  %v683_v50 = vpop.f32.mrf.mxu1  ;;  %v595_v54 = vadd.f32 %v1776_v49, %v594_v47 }
  0xf9   : > { %v769_v52 = vmax.f32 %v721_v48, 0.0  ;;  %v684_v58 = vadd.f32 %v683_v50, %v595_v54 }
  0xfb   : > { %v1283_v53 = vpack.c.bf16 %v769_v52, %v768_v51  ;;  %v754_v63 = vmax.f32 %v684_v58, 0.0 }
  0xfc   : > { %v634_v55 = vpop.f32.mrf.mxu2 }
  0xfd   : > { %1319 = vst [vmem:[%s1783_s27 + $0x50] sm:$0xff] %v1283_v53   ;;  %v723_v56 = vpop.f32.mrf.mxu3  ;;  %v635_v61 = vadd.f32 %v1776_v49, %v634_v55 }
  0xfe   : > { %v596_v57 = vpop.f32.mrf.mxu0 }
  0xff   : > { %v597_v59 = vadd.f32 %v1776_v49, %v596_v57  ;;  %v685_v60 = vpop.f32.mrf.mxu1  ;;  %v724_v2 = vadd.f32 %v723_v56, %v635_v61 }
 0x101   : > { %v686_v62 = vadd.f32 %v685_v60, %v597_v59  ;;  %v770_v9 = vmax.f32 %v724_v2, 0.0 }
 0x103   : > { %v755_v0 = vmax.f32 %v686_v62, 0.0 }
 0x104   : > { %v636_v1 = vpop.f32.mrf.mxu2 }
 0x105   : > { %v1248_v3 = vpack.c.bf16 %v755_v0, %v754_v63  ;;  %v637_v4 = vadd.f32 %v1776_v49, %v636_v1  ;;  %v725_v5 = vpop.f32.mrf.mxu3 }
 0x106   : > { %v599_v6 = vpop.f32.mrf.mxu0 }
 0x107   : > { %1312 = vst [vmem:[%s1783_s27 + $0x18] sm:$0xff] %v1248_v3   ;;  %v726_v7 = vadd.f32 %v725_v5, %v637_v4  ;;  %v688_v8 = vpop.f32.mrf.mxu1  ;;  %v600_v12 = vadd.f32 %v1776_v49, %v599_v6 }
 0x109   : > { %v771_v10 = vmax.f32 %v726_v7, 0.0  ;;  %v689_v16 = vadd.f32 %v688_v8, %v600_v12 }
 0x10b   : > { %v1288_v11 = vpack.c.bf16 %v771_v10, %v770_v9  ;;  %v756_v21 = vmax.f32 %v689_v16, 0.0 }
 0x10c   : > { %v639_v13 = vpop.f32.mrf.mxu2 }
 0x10d   : > { %1320 = vst [vmem:[%s1783_s27 + $0x58] sm:$0xff] %v1288_v11   ;;  %v728_v14 = vpop.f32.mrf.mxu3  ;;  %v640_v19 = vadd.f32 %v1776_v49, %v639_v13 }
 0x10e   : > { %v601_v15 = vpop.f32.mrf.mxu0 }
 0x10f   : > { %v602_v17 = vadd.f32 %v1776_v49, %v601_v15  ;;  %v690_v18 = vpop.f32.mrf.mxu1  ;;  %v729_v24 = vadd.f32 %v728_v14, %v640_v19 }
 0x111   : > { %v691_v20 = vadd.f32 %v690_v18, %v602_v17  ;;  %v772_v31 = vmax.f32 %v729_v24, 0.0 }
 0x113   : > { %v757_v22 = vmax.f32 %v691_v20, 0.0 }
 0x114   : > { %v641_v23 = vpop.f32.mrf.mxu2 }
 0x115   : > { %v1253_v25 = vpack.c.bf16 %v757_v22, %v756_v21  ;;  %v642_v26 = vadd.f32 %v1776_v49, %v641_v23  ;;  %v730_v27 = vpop.f32.mrf.mxu3 }
 0x116   : > { %v604_v28 = vpop.f32.mrf.mxu0 }
 0x117   : > { %1313 = vst [vmem:[%s1783_s27 + $0x20] sm:$0xff] %v1253_v25   ;;  %v731_v29 = vadd.f32 %v730_v27, %v642_v26  ;;  %v693_v30 = vpop.f32.mrf.mxu1  ;;  %v605_v34 = vadd.f32 %v1776_v49, %v604_v28 }
 0x119   : > { %v773_v32 = vmax.f32 %v731_v29, 0.0  ;;  %v694_v38 = vadd.f32 %v693_v30, %v605_v34 }
 0x11b   : > { %v1293_v33 = vpack.c.bf16 %v773_v32, %v772_v31  ;;  %v758_v43 = vmax.f32 %v694_v38, 0.0 }
 0x11c   : > { %v644_v35 = vpop.f32.mrf.mxu2 }
 0x11d   : > { %1321 = vst [vmem:[%s1783_s27 + $0x60] sm:$0xff] %v1293_v33   ;;  %v733_v36 = vpop.f32.mrf.mxu3  ;;  %v645_v41 = vadd.f32 %v1776_v49, %v644_v35 }
 0x11e   : > { %v606_v37 = vpop.f32.mrf.mxu0 }
 0x11f   : > { %v607_v39 = vadd.f32 %v1776_v49, %v606_v37  ;;  %v695_v40 = vpop.f32.mrf.mxu1  ;;  %v734_v46 = vadd.f32 %v733_v36, %v645_v41 }
 0x121   : > { %v696_v42 = vadd.f32 %v695_v40, %v607_v39  ;;  %v774_v54 = vmax.f32 %v734_v46, 0.0 }
 0x123   : > { %v759_v44 = vmax.f32 %v696_v42, 0.0 }
 0x124   : > { %v646_v45 = vpop.f32.mrf.mxu2 }
 0x125   : > { %v1258_v47 = vpack.c.bf16 %v759_v44, %v758_v43  ;;  %v647_v48 = vadd.f32 %v1776_v49, %v646_v45  ;;  %v735_v50 = vpop.f32.mrf.mxu3 }
 0x126   : > { %v609_v51 = vpop.f32.mrf.mxu0 }
 0x127   : > { %1314 = vst [vmem:[%s1783_s27 + $0x28] sm:$0xff] %v1258_v47   ;;  %v736_v52 = vadd.f32 %v735_v50, %v647_v48  ;;  %v698_v53 = vpop.f32.mrf.mxu1  ;;  %v610_v57 = vadd.f32 %v1776_v49, %v609_v51 }
 0x129   : > { %v775_v55 = vmax.f32 %v736_v52, 0.0  ;;  %v699_v61 = vadd.f32 %v698_v53, %v610_v57 }
 0x12b   : > { %v1298_v56 = vpack.c.bf16 %v775_v55, %v774_v54  ;;  %v760_v2 = vmax.f32 %v699_v61, 0.0 }
 0x12c   : > { %v649_v58 = vpop.f32.mrf.mxu2 }
 0x12d   : > { %1322 = vst [vmem:[%s1783_s27 + $0x68] sm:$0xff] %v1298_v56   ;;  %v738_v59 = vpop.f32.mrf.mxu3  ;;  %v650_v0 = vadd.f32 %v1776_v49, %v649_v58 }
 0x12e   : > { %v611_v60 = vpop.f32.mrf.mxu0 }
 0x12f   : > { %v612_v62 = vadd.f32 %v1776_v49, %v611_v60  ;;  %v700_v63 = vpop.f32.mrf.mxu1  ;;  %v739_v5 = vadd.f32 %v738_v59, %v650_v0 }
 0x131   : > { %v701_v1 = vadd.f32 %v700_v63, %v612_v62  ;;  %v776_v12 = vmax.f32 %v739_v5, 0.0 }
 0x133   : > { %v761_v3 = vmax.f32 %v701_v1, 0.0 }
 0x134   : > { %v651_v4 = vpop.f32.mrf.mxu2 }
 0x135   : > { %v1263_v6 = vpack.c.bf16 %v761_v3, %v760_v2  ;;  %v652_v7 = vadd.f32 %v1776_v49, %v651_v4  ;;  %v740_v8 = vpop.f32.mrf.mxu3 }
 0x136   : > { %v614_v9 = vpop.f32.mrf.mxu0 }
 0x137   : > { %1315 = vst [vmem:[%s1783_s27 + $0x30] sm:$0xff] %v1263_v6   ;;  %v741_v10 = vadd.f32 %v740_v8, %v652_v7  ;;  %v703_v11 = vpop.f32.mrf.mxu1  ;;  %v615_v15 = vadd.f32 %v1776_v49, %v614_v9 }
 0x139   : > { %v777_v13 = vmax.f32 %v741_v10, 0.0  ;;  %v704_v19 = vadd.f32 %v703_v11, %v615_v15 }
 0x13b   : > { %v1303_v14 = vpack.c.bf16 %v777_v13, %v776_v12  ;;  %v762_v24 = vmax.f32 %v704_v19, 0.0 }
 0x13c   : > { %v654_v16 = vpop.f32.mrf.mxu2 }
 0x13d   : > { %1323 = vst [vmem:[%s1783_s27 + $0x70] sm:$0xff] %v1303_v14   ;;  %v743_v17 = vpop.f32.mrf.mxu3  ;;  %v655_v22 = vadd.f32 %v1776_v49, %v654_v16 }
 0x13e   : > { %v616_v18 = vpop.f32.mrf.mxu0 }
 0x13f   : > { %v617_v20 = vadd.f32 %v1776_v49, %v616_v18  ;;  %v705_v21 = vpop.f32.mrf.mxu1  ;;  %v744_v27 = vadd.f32 %v743_v17, %v655_v22 }
 0x141   : > { %v706_v23 = vadd.f32 %v705_v21, %v617_v20  ;;  %v778_v32 = vmax.f32 %v744_v27, 0.0 }
 0x143   : > { %v763_v25 = vmax.f32 %v706_v23, 0.0 }
 0x144   : > { %v656_v26 = vpop.f32.mrf.mxu2 }
 0x145   : > { %v1268_v28 = vpack.c.bf16 %v763_v25, %v762_v24  ;;  %v657_v29 = vadd.f32 %v1776_v49, %v656_v26  ;;  %v745_v30 = vpop.f32.mrf.mxu3 }
 0x147   : > { %1316 = vst [vmem:[%s1783_s27 + $0x38] sm:$0xff] %v1268_v28   ;;  %v746_v31 = vadd.f32 %v745_v30, %v657_v29 }
 0x149   : > { %v779_v33 = vmax.f32 %v746_v31, 0.0 }
 0x14b   : > { %v1308_v34 = vpack.c.bf16 %v779_v33, %v778_v32 }
 0x14d   : > { %1324 = vst [vmem:[%s1783_s27 + $0x78] sm:$0xff] %v1308_v34  }
 0x14e   : > { %1508 = shalt.err (!%p1505_p0)
}
 0x14f   : > { %s1574_s6 = smov 64   ;;  %s1575_s1 = smov 4  }
 0x150   : > { %1347 = dma.vmem_to_hbm [thread:$0]  (%p1675_p5), %s859_s26, 2048, %s861_s28, %s845_s15, %s1574_s6, %s1574_s6, %s1575_s1  }
 0x151 PF: > { %s875_s20 = sand.u32 1, %s1547_s12   ;;  %p1358_p3 = pnand %p973_p11, %p1645_p6 }
 0x152   : > { %s876_s22 = scalar_lea.sflag [#allocation4], %s875_s20 }
 0x153   : > { %p1359_p7 = pneg %p1358_p3 }
 0x155   : > { %1542 = dma.done.wait (%p1359_p7), %s876_s22, 2048  }
 0x156   : > { %1544 = vsyncadd (%p1359_p7), %s876_s22, 4294965248  ;;  %s20_s17 = sadd.s32 1, %s1567_s17   ;;  %s1881_s12 = smov %s1551_s13 }
 0x157   : > { %p17_p9 = scmp.ge.s32.totalorder %s20_s17, 4   ;;  %s1882_s13 = smov %s1555_s14 }
 0x158   : > { %s1883_s14 = smov %s1684_s18  ;;  %s1884_s15 = smov %s1563_s16 }
 0x159   : > { %s1885_s16 = smov %s1887_s5  ;;  %19 = sbr.rel (!%p17_p9) target bundleno = 9 (0x9), region = 85 }
 0x15e   :  { %882 = vsyncpa [#allocation3], 1 }
 0x15f   :  { %884 = vsyncpa [#allocation3 + $0x1], 1 }
 0x160   :  { %885 = vsyncpa [#allocation6], 1 }
 0x161   :  { %886 = vsyncpa [#allocation4], 1 }
 0x162   :  { %888 = vsyncpa [#allocation4 + $0x1], 1 }

</bundles_post_ra>
